<compile_context>
chip_gen: v5e
topology: v5e:2x2
jax: 0.10.0
libtpu: 0.0.40
codegen_flags: <defaults>
</compile_context>

<pallas_src>
import functools

import jax
import jax.numpy as jnp
from jax.experimental import pallas as pl
from jax.experimental.pallas import tpu as pltpu


# ----------------------------- Pallas kernel -------------------------------

def _proj_kernel(a_ref, w_ref, b_ref, o_ref):
    # a_ref: (tm, Kp)  bf16 patches tile (streamed)
    # w_ref: (Kp, tn)  bf16 projection weight tile (VMEM-resident across the
    #                  inner M sweep because its block index is constant there)
    # b_ref: (1, tn)   f32 bias tile (broadcast over rows)
    # o_ref: (tm, tn)  bf16 output tile: f32 accumulate + f32 bias, cast at store
    acc = jnp.dot(a_ref[...], w_ref[...], preferred_element_type=jnp.float32)
    o_ref[...] = (acc + b_ref[...]).astype(o_ref.dtype)


def _round_up(x, m):
    return ((x + m - 1) // m) * m


def _vmem_capacity_bytes():
    """Physical VMEM of the current chip (v5e/v6e: 128 MiB, v7x: 64 MiB)."""
    try:
        cap = getattr(pltpu.get_tpu_info(), "vmem_capacity_bytes", None)
        if cap:
            return max(int(cap), 32 * 1024 * 1024)
    except Exception:
        pass
    return 64 * 1024 * 1024  # conservative (v7x-sized) fallback


def _pick_tiles(M, Kp, Np, a_bytes, w_bytes, o_bytes, budget):
    """Choose (tm, tn) under a per-chip VMEM budget."""
    # Keep N whole so the A stream is fetched exactly once; only split if the
    # (double-buffered) weight alone would blow the budget.  tn stays a
    # 128-multiple divisor of Np -> every output column is covered.
    tn = Np
    while 2 * Kp * tn * w_bytes > budget // 2 and tn % 256 == 0:
        tn //= 2

    # >= 2 M tiles so both v7x TensorCores get work; tm rounded to 16 (bf16
    # native sublane tile); larger tm allowed on 128-MiB-VMEM chips.
    tm_cap = 1024 if budget >= (40 << 20) else 512
    tm = min(tm_cap, max(16, _round_up((M + 1) // 2, 16)))
    while True:
        need = (2 * tm * Kp * a_bytes      # double-buffered A stream
                + 2 * Kp * tn * w_bytes    # (at most) double-buffered weight
                + 2 * tm * tn * o_bytes    # double-buffered output
                + 2 * tn * 4)              # bias (f32)
        if need <= budget or tm <= 16:
            break
        tm = max(16, _round_up(tm // 2, 16))
    return tm, tn, need


def patch_proj_matmul(patches, w_pad, b_pad, out_dtype=jnp.bfloat16):
    """patches: (M, Kp) bf16, w_pad: (Kp, Np) bf16, b_pad: (1, Np) f32
    -> (M, Np) out_dtype.  Kp and Np must be multiples of 128 (pre-padded)."""
    M, Kp = patches.shape
    Kp2, Np = w_pad.shape
    assert Kp == Kp2 and Np % 128 == 0 and Kp % 128 == 0

    a_bytes = jnp.dtype(patches.dtype).itemsize
    w_bytes = jnp.dtype(w_pad.dtype).itemsize
    o_bytes = jnp.dtype(out_dtype).itemsize

    cap = _vmem_capacity_bytes()
    budget = min(cap // 2, 48 << 20)            # tile-picking budget (per chip)
    tm, tn, need = _pick_tiles(M, Kp, Np, a_bytes, w_bytes, o_bytes, budget)
    # Explicit scoped-VMEM limit: v5e's default is only 16 MiB; give the chosen
    # tiling (plus compiler scratch) guaranteed headroom, never exceeding phys.
    vmem_limit = int(min(cap - (8 << 20), max(budget, need + (8 << 20))))

    ni = pl.cdiv(M, tm)   # M tiles (inner grid axis; edge block masked -- safe,
                          # there is no K-axis grid reduction)
    nj = Np // tn         # N tiles (outer axis; tn divides Np, usually nj == 1)

    cost = pl.CostEstimate(
        flops=2 * M * Kp * Np,
        transcendentals=0,
        bytes_accessed=(M * Kp * a_bytes + Kp * Np * w_bytes + Np * 4
                        + M * Np * o_bytes),
    )

    # TODO(synk): if profiling at realistic shapes shows exposed DMA (tiny K ->
    # short MXU steps), add pipeline_mode=pl.Buffered(3) on the streamed
    # patches/output specs, VMEM budget permitting.
    return pl.pallas_call(
        _proj_kernel,
        out_shape=jax.ShapeDtypeStruct((M, Np), out_dtype),
        grid_spec=pltpu.PrefetchScalarGridSpec(
            num_scalar_prefetch=0,
            # N-axis OUTER, M-axis INNER: weight/bias block index is constant
            # across the inner sweep -> Pallas skips the redundant weight DMA.
            grid=(nj, ni),
            in_specs=[
                pl.BlockSpec((tm, Kp), lambda j, i: (i, 0)),   # patches (streamed)
                pl.BlockSpec((Kp, tn), lambda j, i: (0, j)),   # weight (resident)
                pl.BlockSpec((1, tn), lambda j, i: (0, j)),    # bias   (resident)
            ],
            out_specs=pl.BlockSpec((tm, tn), lambda j, i: (i, j)),
        ),
        compiler_params=pltpu.CompilerParams(
            dimension_semantics=("parallel", "parallel"),
            vmem_limit_bytes=vmem_limit,
        ),
        cost_estimate=cost,
    )(patches, w_pad, b_pad)


# ------------------------------ glue (JAX) ----------------------------------

def extract_patches_nchw(x, patch_size, stride):
    """x: (B, C, H, W) -> (B, num_patches, C*ph*pw); per-patch flattening order
    is (C, ph, pw), matching PyTorch Conv2d weight.reshape(E, -1)."""
    B, C, H, W = x.shape
    ph, pw = patch_size
    gh = (H - ph) // stride + 1
    gw = (W - pw) // stride + 1
    if stride == ph == pw and H % ph == 0 and W % pw == 0:
        # Non-overlapping fast path: one fused transpose (XLA fuses the
        # subsequent bf16 cast / K-pad into this pass).
        p = x.reshape(B, C, gh, ph, gw, pw)
        p = p.transpose(0, 2, 4, 1, 3, 5)          # (B, gh, gw, C, ph, pw)
        return p.reshape(B, gh * gw, C * ph * pw)
    # General (overlapping) extraction: one fused XLA op, feature order (C, ph, pw).
    p = jax.lax.conv_general_dilated_patches(
        x, filter_shape=(ph, pw), window_strides=(stride, stride),
        padding="VALID", dimension_numbers=("NCHW", "OIHW", "NCHW"))
    # p: (B, C*ph*pw, gh, gw)
    return p.reshape(B, C * ph * pw, gh * gw).transpose(0, 2, 1)


class PatchEmbedPallas:
    """JAX/Pallas equivalent of the PyTorch PatchEmbed module (norm_layer=None)."""

    def __init__(self, img_size=(16, 16), patch_size=(4, 4), stride=4,
                 in_chans=4, embed_dim=32, flatten=True,
                 compute_dtype=jnp.bfloat16, key=None):
        self.img_size = img_size
        self.patch_size = patch_size
        self.stride = stride
        self.grid_size = ((img_size[0] - patch_size[0]) // stride + 1,
                          (img_size[1] - patch_size[1]) // stride + 1)
        self.num_patches = self.grid_size[0] * self.grid_size[1]
        self.flatten = flatten
        self.in_chans = in_chans
        self.embed_dim = embed_dim
        self.compute_dtype = compute_dtype

        if key is None:
            key = jax.random.PRNGKey(0)
        kw, kb = jax.random.split(key)
        fan_in = in_chans * patch_size[0] * patch_size[1]
        bound = 1.0 / (fan_in ** 0.5)
        # PyTorch Conv2d weight shape: (embed_dim, in_chans, ph, pw)
        self.conv_weight = jax.random.uniform(
            kw, (embed_dim, in_chans, patch_size[0], patch_size[1]),
            minval=-bound, maxval=bound, dtype=jnp.float32)
        self.conv_bias = jax.random.uniform(
            kb, (embed_dim,), minval=-bound, maxval=bound, dtype=jnp.float32)

        # Static pre-processing of projection weights (done ONCE, not per call):
        #  - flatten to (K, E) matching the (C, ph, pw) patch order,
        #  - pad the contraction axis K and the lane axis E to multiples of 128
        #    (free for the weight; no E padding when embed_dim % 128 == 0),
        #  - cast to the compute dtype (bf16) to halve weight DMA traffic.
        self.K = fan_in
        self.Kp = _round_up(fan_in, 128)
        self.Np = _round_up(embed_dim, 128)   # == embed_dim for ViT 768/1024/...
        w_mat = self.conv_weight.reshape(embed_dim, fan_in).T       # (K, E) f32
        self.w_pad = (jnp.zeros((self.Kp, self.Np), compute_dtype)
                      .at[:fan_in, :embed_dim].set(w_mat.astype(compute_dtype)))
        self.b_pad = (jnp.zeros((1, self.Np), jnp.float32)
                      .at[0, :embed_dim].set(self.conv_bias))
        # TODO(synk): norm_layer is None in this config -> Identity; a Pallas
        # LayerNorm kernel would be added here if norm_layer were supplied.
        # TODO(synk): larger structural option -- fuse im2col into the kernel
        # (memory_space=pl.ANY + manual strided DMA) to remove the activation
        # round-trip through HBM for the patch-extraction pass.

    @functools.partial(jax.jit, static_argnums=0)
    def __call__(self, x):
        B, C, H, W = x.shape
        patches = extract_patches_nchw(x, self.patch_size, self.stride)
        M = B * self.num_patches
        a = patches.reshape(M, self.K).astype(self.compute_dtype)
        if self.Kp != self.K:
            # Zero-pad the contraction axis (fuses into the im2col pass).
            a = jnp.pad(a, ((0, 0), (0, self.Kp - self.K)))
        out2d = patch_proj_matmul(a, self.w_pad, self.b_pad,
                                  out_dtype=self.compute_dtype)   # (M, Np) bf16
        out = out2d.reshape(B, self.num_patches, self.Np)
        if self.Np != self.embed_dim:
            # Only needed when embed_dim is not a multiple of 128 (bf16 slice).
            out = out[..., :self.embed_dim]
        if not self.flatten:
            out = out.reshape(B, self.grid_size[0], self.grid_size[1],
                              self.embed_dim).transpose(0, 3, 1, 2)
        return out  # norm is Identity; output stays in the bf16 compute dtype


# ------------------------------- main ---------------------------------------

if __name__ == "__main__":
    key = jax.random.PRNGKey(0)
    kx, kp = jax.random.split(key)

    B, C, H, W = 2, 4, 16, 16
    module = PatchEmbedPallas(img_size=(H, W), patch_size=(4, 4), stride=4,
                              in_chans=C, embed_dim=32, key=kp)
    x = jax.random.normal(kx, (B, C, H, W), dtype=jnp.float32)

    out = jax.block_until_ready(module(x))
    assert out.shape == (B, module.num_patches, module.embed_dim)
    assert out.dtype == module.compute_dtype

    # Reference mirroring the kernel math (bf16 A/W, f32 accumulate, f32 bias).
    patches = extract_patches_nchw(x, module.patch_size, module.stride)
    w_mat = module.conv_weight.reshape(module.embed_dim, -1).T
    ref = jnp.einsum("bpk,kn->bpn",
                     patches.astype(jnp.bfloat16), w_mat.astype(jnp.bfloat16),
                     preferred_element_type=jnp.float32) + module.conv_bias
    out_f32 = out.astype(jnp.float32)
    assert jnp.allclose(out_f32, ref, atol=2e-2, rtol=2e-2), \
        float(jnp.max(jnp.abs(out_f32 - ref)))

    # Also close to the full-f32 conv reference (bf16 rounding tolerance).
    ref32 = jnp.einsum("bpk,kn->bpn", patches, w_mat) + module.conv_bias
    assert jnp.allclose(out_f32, ref32, atol=6e-2, rtol=6e-2)

    print("KERNEL_OK")
</pallas_src>

<mosaic_0001>
module attributes {stable_mosaic.version = 11 : i64} {
  func.func @_proj_kernel(%arg0: i32, %arg1: i32, %arg2: memref<16x128xbf16, #tpu.memory_space<vmem>>, %arg3: memref<128x128xbf16, #tpu.memory_space<vmem>>, %arg4: memref<1x128xf32, #tpu.memory_space<vmem>>, %arg5: memref<16x128xbf16, #tpu.memory_space<vmem>>) attributes {dimension_semantics = [#tpu.dimension_semantics<parallel>, #tpu.dimension_semantics<parallel>], iteration_bounds = array<i64: 1, 2>, scalar_prefetch = 0 : i64, scratch_operands = 0 : i64, tpu.core_type = #tpu.core_type<tc>, window_params = [{transform_indices = @transform_0, window_bounds = array<i64: 16, 128>}, {transform_indices = @transform_1, window_bounds = array<i64: 128, 128>}, {transform_indices = @transform_2, window_bounds = array<i64: 1, 128>}, {transform_indices = @transform_3, window_bounds = array<i64: 16, 128>}]} {
    %c0 = arith.constant 0 : index
    %c0_0 = arith.constant 0 : index
    %0 = vector.load %arg2[%c0, %c0_0] : memref<16x128xbf16, #tpu.memory_space<vmem>>, vector<16x128xbf16>
    %c0_1 = arith.constant 0 : index
    %c0_2 = arith.constant 0 : index
    %1 = vector.load %arg3[%c0_1, %c0_2] : memref<128x128xbf16, #tpu.memory_space<vmem>>, vector<128x128xbf16>
    %cst = arith.constant dense<0.000000e+00> : vector<16x128xf32>
    %2 = tpu.matmul %0, %1, %cst {dimension_numbers = #tpu.dot_dimension_numbers<[1], [0], [0], [1], [0, 0, 1, 1], [], []>} : vector<16x128xbf16>, vector<128x128xbf16>, vector<16x128xf32> -> vector<16x128xf32>
    %c0_3 = arith.constant 0 : index
    %c0_4 = arith.constant 0 : index
    %3 = vector.load %arg4[%c0_3, %c0_4] : memref<1x128xf32, #tpu.memory_space<vmem>>, vector<1x128xf32>
    %4 = vector.broadcast %3 : vector<1x128xf32> to vector<16x128xf32>
    %5 = arith.addf %2, %4 : vector<16x128xf32>
    %6 = arith.truncf %5 : vector<16x128xf32> to vector<16x128xbf16>
    %c0_5 = arith.constant 0 : index
    %c0_6 = arith.constant 0 : index
    %7 = vector.load %arg5[%c0_5, %c0_6] : memref<16x128xbf16, #tpu.memory_space<vmem>>, vector<16x128xbf16>
    tpu.vector_store %arg5[%c0_5, %c0_6], %6 {strides = array<i32>} : memref<16x128xbf16, #tpu.memory_space<vmem>>, vector<16x128xbf16>,
    return
  }
  func.func @transform_0(%arg0: i32, %arg1: i32) -> (i32, i32) {
    %c0_i32 = arith.constant 0 : i32
    %c0_i32_0 = arith.constant 0 : i32
    return %arg1, %c0_i32 : i32, i32
  }
  func.func @transform_1(%arg0: i32, %arg1: i32) -> (i32, i32) {
    %c0_i32 = arith.constant 0 : i32
    %c0_i32_0 = arith.constant 0 : i32
    return %c0_i32, %arg0 : i32, i32
  }
  func.func @transform_2(%arg0: i32, %arg1: i32) -> (i32, i32) {
    %c0_i32 = arith.constant 0 : i32
    %c0_i32_0 = arith.constant 0 : i32
    return %c0_i32, %arg0 : i32, i32
  }
  func.func @transform_3(%arg0: i32, %arg1: i32) -> (i32, i32) {
    %c0_i32 = arith.constant 0 : i32
    return %arg1, %arg0 : i32, i32
  }
}

</mosaic_0001>

<bundles_post_ra>
// kernel: a_call__.1
= control target key start
LH: loop header
LB: loop body
LE: loop exit
PB: predicated region body
PF: predicated region fallthrough
CT: control target
= control target key end

     0   :  { %8 = vsyncpa [#allocation3], 0  ;;  %s779_s0 = inlined_call_operand.vmem [shape: bf16[32,128], index: 0, kind: input, shape index: {}]   ;;  %s780_s1 = inlined_call_operand.vmem [shape: bf16[128,128], index: 1, kind: input, shape index: {}]   ;;  %s781_s2 = inlined_call_operand.vmem [shape: f32[1,128], index: 2, kind: input, shape index: {}]   ;;  %s782_s3 = inlined_call_operand.hbm [shape: bf16[32,128], index: 3, kind: output, shape index: {}]  }
   0x1   :  { %10 = vsyncpa [#allocation3 + $0x1], 0  ;;  %s653_s12 = smov 0   ;;  %s655_s13 = smov 0  }
   0x2   :  { %s657_s14 = smov 0   ;;  %s659_s15 = smov 0  }
   0x3   :  { %s661_s16 = smov 0   ;;  %s663_s17 = smov 0  }
   0x4 LB: > { %s427_s18 = sadd.s32 4294967295, %s629_s17   ;;  %s428_s19 = sadd.s32 4294967294, %s629_s17   ;;  %s629_s17 = sphi %s663_s17, %s16_s17   ;;  %s625_s16 = sphi %s661_s16, %s789_s16   ;;  %s621_s15 = sphi %s659_s15, %s788_s15   ;;  %s617_s14 = sphi %s657_s14, %s787_s14   ;;  %s613_s13 = sphi %s655_s13, %s786_s13   ;;  %s609_s12 = sphi %s653_s12, %s785_s12  }
   0x5   : > { %s25_s20 = sadd.s32 1, %s625_s16  ;;  %s115_s21 = sadd.s32 1, %s617_s14 }
   0x6   : > { %p26_p0 = scmp.ge.s32.totalorder %s25_s20, 2  ;;  %p125_p1 = scmp.ne.s32.totalorder %s617_s14, %s613_s13 }
   0x7   : > { %p126_p2 = scmp.eq.s32.totalorder %s427_s18, 1  ;;  %p131_p3 = scmp.ne.s32.totalorder %s613_s13, %s609_s12 }
   0x8   : > { %s791_s20 = smov (%p26_p0, %s25_s20), 0  ;;  %p132_p5 = scmp.eq.s32.totalorder %s428_s19, 1 }
   0x9   : > { %p693_p4 = por %p126_p2, %p125_p1  ;;  %s110_s23 = ssub.s32 %s625_s16, %s791_s20 }
   0xa   : > { %p433_p6 = scmp.ge.s32.totalorder %s629_s17, 1  ;;  %p113_p7 = scmp.eq.s32.totalorder %s110_s23, 0 }
   0xb   : > { %p700_p8 = por %p132_p5, %p131_p3  ;;  %p172_p9 = scmp.lt.s32.totalorder %s629_s17, 3 }
   0xc   : > { %s706_s25 = scalar_select %p113_p7, %s617_s14, %s115_s21  }
   0xd   : > { %p173_p10 = pnand %p433_p6, %p172_p9 }
   0xe   : > { %s435_s7 = sshll.u32 (!%p173_p10), %s621_s15, 1  ;;  %s200_s30 = sand.u32 (!%p173_p10), 1, %s613_s13  }
   0xf   : > { %176 = sbr.rel (%p173_p10) target bundleno = 194 (0xc2), region = 32  ;;  %p204_p11 = scmp.lt.s32.totalorder (!%p173_p10), %s435_s7, 3 }
  0x10   : > { %s434_s4 = sshll.u32 (!%p173_p10), %s200_s30, 3  ;;  %s487_s5 = sshll.u32 (!%p173_p10), %s621_s15, 3 }
  0x11   : > { %s202_s11 = scalar_lea.vmem (!%p173_p10), [#allocation2], %s434_s4  ;;  %s312_s15 = scalar_lea.sflag (!%p173_p10), [#allocation3], %s200_s30 }
  0x12   : > { %s744_s18 = sshll.u32 (!%p173_p10), %s202_s11, 4  ;;  %s571_s28 = scalar_lea.hbm (!%p173_p10), %s782_s3, 16  ;;  %s326_s18 = int_to_ptr.vmem [resolvable:$true] %s744_s18 }
  0x14   : > { %v486_v0 = vld [vmem:[%s780_s1 + $0x38] sm:$0xff]  ;;  %v485_v1 = vld [vmem:[%s780_s1 + $0x30] sm:$0xff]  ;;  %v484_v2 = vld [vmem:[%s780_s1 + $0x28] sm:$0xff]  ;;  %s793_s7 = smov (!%p204_p11, %s435_s7), 3 }
  0x15   : > { %293 = vmatpush.bf16.msra.mxu0 %v486_v0  ;;  %v483_v3 = vld [vmem:[%s780_s1 + $0x20] sm:$0xff]  ;;  %v482_v4 = vld [vmem:[%s780_s1 + $0x18] sm:$0xff]  ;;  %v481_v5 = vld [vmem:[%s780_s1 + $0x10] sm:$0xff]  ;;  %s436_s21 = sshll.u32 %s793_s7, 2  ;;  %s324_s7 = scalar_lea.hbm %s782_s3, %s487_s5 }
  0x16   : > { %v480_v6 = vld [vmem:[%s780_s1 + $0x8] sm:$0xff]  ;;  %v479_v7 = vld [vmem:[%s780_s1] sm:$0xff]  ;;  %s207_s29 = scalar_lea.vmem %s779_s0, %s436_s21  ;;  %s327_s19 = sshll.u32 %s324_s7, 4  ;;  %s328_s19 = int_to_ptr.hbm [resolvable:$true] %s327_s19 }
  0x17   : > { %v478_v8 = vld [vmem:[%s207_s29] sm:$0xff]  ;;  %s565_s21 = sshra.s32 %s328_s19, 4  ;;  %s566_s21 = int_to_ptr.hbm [resolvable:$true] %s565_s21 }
  0x18   : > { %v550_v10 = vld [vmem:[%s781_s2] ss:$0 sm:$0xff]  ;;  %s567_s23 = scalar_lea.hbm %s566_s21, 8  ;;  %p572_p1 = scmp.lt.s32.totalorder %s566_s21, %s782_s3 }
  0x19   : > { %294 = vmatpush.bf16.msra.mxu0 %v485_v1  ;;  %p568_p12 = scmp.ne.s32.totalorder %s566_s21, %s567_s23  ;;  %p573_p2 = scmp.lt.s32.totalorder %s571_s28, %s567_s23 }
  0x1b   : > { %p569_p13 = pnand %p568_p12, %p693_p4  ;;  %p574_p3 = por %p573_p2, %p572_p1 }
  0x1d   : > { %295 = vmatpush.bf16.msra.mxu0 %v484_v2  ;;  %p570_p0 = pneg %p569_p13 }
  0x1f   : > { %p575_p5 = pnand %p574_p3, %p570_p0 }
  0x21   : > { %296 = vmatpush.bf16.msra.mxu0 %v483_v3 }
  0x25   : > { %297 = vmatpush.bf16.msra.mxu0 %v482_v4 }
  0x29   : > { %298 = vmatpush.bf16.msra.mxu0 %v481_v5 }
  0x2d   : > { %299 = vmatpush.bf16.msra.mxu0 %v480_v6 }
  0x31   : > { %300 = vmatpush.bf16.msra.mxu0 %v479_v7 }
  0x34   : > { %301 = vmatmul.bf16.vlgmr.msra.gmra.mxu0 %v478_v8 }
  0xb1   : > { %v302_v9 = vpop.f32.mrf.mxu0 }
  0xb2   : > { %v303_v12 = vadd.f32 %v550_v10, %v302_v9 }
  0xb9   : > { %v304_v11 = vpop.f32.mrf.mxu0 }
  0xba   : > { %v305_v13 = vadd.f32 %v550_v10, %v304_v11 }
  0xbc   : > { %v491_v14 = vpack.c.bf16 %v305_v13, %v303_v12 }
  0xbe   : > { %492 = vst [vmem:[%s202_s11] sm:$0xff] %v491_v14  }
  0xbf   : > { %578 = shalt.err (!%p575_p5)
}
  0xc0   : > { %s631_s30 = smov 64   ;;  %s632_s5 = smov 4  }
  0xc1   : > { %493 = dma.vmem_to_hbm [thread:$0]  (%p693_p4), %s326_s18, 128, %s328_s19, %s312_s15, %s631_s30, %s631_s30, %s632_s5  }
  0xc2 PF: > { %p499_p6 = scmp.ge.s32.totalorder %s629_s17, 2  ;;  %s342_s6 = sand.u32 1, %s609_s12  }
  0xc3   : > { %s343_s8 = scalar_lea.sflag [#allocation3], %s342_s6 }
  0xc4   : > { %p496_p7 = pnand %p499_p6, %p700_p8 }
  0xc6   : > { %p497_p9 = pneg %p496_p7 }
  0xc8   : > { %604 = dma.done.wait (%p497_p9), %s343_s8, 128  }
  0xc9   : > { %606 = vsyncadd (%p497_p9), %s343_s8, 4294967168  ;;  %s16_s17 = sadd.s32 1, %s629_s17   ;;  %s785_s12 = smov %s613_s13 }
  0xca   : > { %p13_p10 = scmp.ge.s32.totalorder %s16_s17, 4   ;;  %s786_s13 = smov %s617_s14 }
  0xcb   : > { %s787_s14 = smov %s706_s25  ;;  %s788_s15 = smov %s625_s16 }
  0xcc   : > { %s789_s16 = smov %s791_s20  ;;  %15 = sbr.rel (!%p13_p10) target bundleno = 4 (0x4), region = 73 }
  0xd1   :  { %349 = vsyncpa [#allocation3], 1 }
  0xd2   :  { %351 = vsyncpa [#allocation3 + $0x1], 1 }

</bundles_post_ra>
